<compile_context>
chip_gen: v6e
topology: v6e:2x2x1
jax: 0.10.0
libtpu: 0.0.40
codegen_flags: <defaults>
</compile_context>

<pallas_src>
import functools

import jax
import jax.numpy as jnp
from jax import lax
from jax.experimental import pallas as pl
from jax.experimental.pallas import tpu as pltpu


_JC = 8                                 # j-axis chunk size (one sublane group)
_MAX_STATIC_CHUNKS = 16                 # statically unroll chunk loop up to this
_VMEM_TILE_BUDGET = 16 * 1024 * 1024    # rough per-tile working-set budget
_VMEM_LIMIT = 32 * 1024 * 1024          # scoped VMEM limit (safe on v5e/v6e/v7x)


def _round_up(a, b):
    return (a + b - 1) // b * b


def _sparsemax_kernel(x_ref, o_ref, *, jc):
    x = x_ref[...].astype(jnp.float32)                      # (TB, D)
    z = x - jnp.max(x, axis=-1, keepdims=True)              # shift by row max
    tb, d = z.shape
    d_pad = _round_up(d, jc)
    if d_pad != d:
        # Pad the j axis with -inf so padded columns never count in k or S.
        pad = jnp.full((tb, d_pad - d), -jnp.inf, jnp.float32)
        z_j_src = jnp.concatenate([z, pad], axis=1)
    else:
        z_j_src = z
    n_chunks = d_pad // jc

    z_row = z[:, None, :]                                   # (TB, 1, D), i on lanes
    k0 = jnp.zeros((tb, jc, d), jnp.float32)
    s0 = jnp.zeros((tb, jc, d), jnp.float32)

    def chunk_update(zj_chunk, k_acc, s_acc):
        zj = zj_chunk[:, :, None]                           # (TB, jc, 1), j on sublanes
        cmp = zj >= z_row                                   # (TB, jc, D) bool
        k_acc = k_acc + jnp.where(cmp, 1.0, 0.0)            # count partials
        s_acc = s_acc + jnp.where(cmp, zj, 0.0)             # sum partials
        return k_acc, s_acc

    if n_chunks <= _MAX_STATIC_CHUNKS:
        k_acc, s_acc = k0, s0
        for c in range(n_chunks):
            zj_chunk = z_j_src[:, c * jc:(c + 1) * jc]
            k_acc, s_acc = chunk_update(zj_chunk, k_acc, s_acc)
    else:
        def body(c, carry):
            k_acc, s_acc = carry
            j0 = pl.multiple_of(c * jc, jc)
            zj_chunk = lax.dynamic_slice_in_dim(z_j_src, j0, jc, axis=1)
            return chunk_update(zj_chunk, k_acc, s_acc)
        k_acc, s_acc = lax.fori_loop(0, n_chunks, body, (k0, s0))

    k = jnp.sum(k_acc, axis=1)                              # (TB, D)  #{z_j >= z_i}
    s = jnp.sum(s_acc, axis=1)                              # (TB, D)  sum_{z_j >= z_i} z_j

    in_support = (1.0 + k * z) > s                          # tie-invariant support test
    supp_size = jnp.sum(jnp.where(in_support, 1.0, 0.0), axis=-1, keepdims=True)
    sum_top = jnp.sum(jnp.where(in_support, z, 0.0), axis=-1, keepdims=True)
    tau = (sum_top - 1.0) / supp_size
    o_ref[...] = jnp.maximum(z - tau, 0.0).astype(o_ref.dtype)


def _pick_block_rows(n_rows, d_pad, row_align, itemsize):
    # Rough live f32 bytes per tile row: x/z/pad/output temporaries (~6*d),
    # two (jc, d) accumulators plus per-chunk transients (~5*jc*d), and
    # double-buffered in/out tiles (4 tiles at the io itemsize).
    per_row = 4 * (6 * d_pad + 5 * _JC * d_pad) + 4 * d_pad * itemsize
    tb = _VMEM_TILE_BUDGET // max(per_row, 1)
    tb = max(row_align, min(1024, tb))
    tb = (tb // row_align) * row_align
    tb = min(tb, n_rows)
    # Keep >=2 grid steps when possible so the parallel row axis can shard
    # across the two TensorCores on v7x (neutral on v5e/v6e).
    if n_rows >= 2 * row_align:
        tb = min(tb, _round_up(pl.cdiv(n_rows, 2), row_align))
    return tb


def sparsemax(x, block_rows=None):
    """Sparsemax along the last axis. Any input shape; same shape/dtype out."""
    orig_shape = x.shape
    d = orig_shape[-1]
    x2 = x.reshape(-1, d)
    n = x2.shape[0]

    itemsize = jnp.dtype(x.dtype).itemsize
    # Sublane alignment for the row axis (8 for 32-bit; 32 covers packed dtypes).
    row_align = 8 if itemsize >= 4 else 32
    n_rows = _round_up(n, row_align)
    if n_rows != n:
        x2 = jnp.concatenate(
            [x2, jnp.zeros((n_rows - n, d), x2.dtype)], axis=0)

    d_pad = _round_up(d, _JC)
    if block_rows is None:
        block_rows = _pick_block_rows(n_rows, d_pad, row_align, itemsize)
    else:
        block_rows = min(_round_up(block_rows, row_align), n_rows)

    grid = pl.cdiv(n_rows, block_rows)
    kernel = functools.partial(_sparsemax_kernel, jc=_JC)

    out = pl.pallas_call(
        kernel,
        out_shape=jax.ShapeDtypeStruct((n_rows, d), x.dtype),
        grid_spec=pltpu.PrefetchScalarGridSpec(
            num_scalar_prefetch=0,
            grid=(grid,),
            in_specs=[pl.BlockSpec((block_rows, d), lambda i: (i, 0))],
            out_specs=pl.BlockSpec((block_rows, d), lambda i: (i, 0)),
        ),
        compiler_params=pltpu.CompilerParams(
            dimension_semantics=("parallel",),
            vmem_limit_bytes=_VMEM_LIMIT),
    )(x2)

    return out[:n].reshape(orig_shape)


def _sparsemax_ref(x):
    """Pure-JAX reference mirroring SparsemaxFunction.forward (sort-based)."""
    z = x - jnp.max(x, axis=-1, keepdims=True)
    z_srt = -jnp.sort(-z, axis=-1)                     # descending sort
    z_cumsum = jnp.cumsum(z_srt, axis=-1) - 1.0
    d = x.shape[-1]
    rhos = jnp.arange(1, d + 1, dtype=x.dtype)
    support = rhos * z_srt > z_cumsum
    supp_size = jnp.sum(support, axis=-1, keepdims=True)
    tau = jnp.take_along_axis(z_cumsum, supp_size - 1, axis=-1)
    tau = tau / supp_size.astype(x.dtype)
    return jnp.maximum(z - tau, 0.0)


if __name__ == "__main__":
    key = jax.random.PRNGKey(0)
    # Sparsemax has no learnable parameters; module default dim=-1.
    x = jax.random.normal(key, (2, 4, 32), dtype=jnp.float32)

    out = jax.block_until_ready(sparsemax(x))
    ref = _sparsemax_ref(x)
    assert out.shape == x.shape and out.dtype == x.dtype
    assert jnp.allclose(out, ref, atol=1e-5, rtol=1e-5)
    # sparsemax projects each row onto the probability simplex
    assert jnp.allclose(out.sum(-1), 1.0, atol=1e-5)

    # Ragged row count + multi-step grid path (rows padded to sublane multiple,
    # grid of 2 parallel row blocks).
    x2 = jax.random.normal(jax.random.PRNGKey(1), (5, 3, 24), dtype=jnp.float32)
    out2 = jax.block_until_ready(sparsemax(x2))
    ref2 = _sparsemax_ref(x2)
    assert out2.shape == x2.shape and out2.dtype == x2.dtype
    assert jnp.allclose(out2, ref2, atol=1e-5, rtol=1e-5)

    print("KERNEL_OK")
</pallas_src>

<mosaic_0001>
module attributes {stable_mosaic.version = 11 : i64} {
  func.func @_sparsemax_kernel(%arg0: i32, %arg1: memref<8x32xf32, #tpu.memory_space<vmem>>, %arg2: memref<8x32xf32, #tpu.memory_space<vmem>>) attributes {dimension_semantics = [#tpu.dimension_semantics<parallel>], iteration_bounds = array<i64: 1>, scalar_prefetch = 0 : i64, scratch_operands = 0 : i64, tpu.core_type = #tpu.core_type<tc>, window_params = [{transform_indices = @transform_0, window_bounds = array<i64: 8, 32>}, {transform_indices = @transform_1, window_bounds = array<i64: 8, 32>}]} {
    %c0 = arith.constant 0 : index
    %c0_0 = arith.constant 0 : index
    %0 = vector.load %arg1[%c0, %c0_0] : memref<8x32xf32, #tpu.memory_space<vmem>>, vector<8x32xf32>
    %cst = arith.constant dense<0xFF800000> : vector<8xf32>
    %1 = vector.multi_reduction <maximumf>, %0, %cst [1] : vector<8x32xf32> to vector<8xf32>
    %2 = vector.shape_cast %1 : vector<8xf32> to vector<8x1xf32>
    %3 = vector.broadcast %2 : vector<8x1xf32> to vector<8x32xf32>
    %4 = arith.subf %0, %3 : vector<8x32xf32>
    %5 = vector.shape_cast %4 : vector<8x32xf32> to vector<8x1x32xf32>
    %cst_1 = arith.constant 0.000000e+00 : f32
    %6 = vector.broadcast %cst_1 : f32 to vector<8x8x32xf32>
    %cst_2 = arith.constant 0.000000e+00 : f32
    %7 = vector.broadcast %cst_2 : f32 to vector<8x8x32xf32>
    %8 = vector.extract_strided_slice %4 {offsets = [0, 0], sizes = [8, 8], strides = [1, 1]} : vector<8x32xf32> to vector<8x8xf32>
    %9 = vector.shape_cast %8 : vector<8x8xf32> to vector<8x8x1xf32>
    %10 = vector.broadcast %9 : vector<8x8x1xf32> to vector<8x8x32xf32>
    %11 = vector.broadcast %5 : vector<8x1x32xf32> to vector<8x8x32xf32>
    %12 = arith.cmpf oge, %10, %11 : vector<8x8x32xf32>
    %cst_3 = arith.constant 1.000000e+00 : f32
    %cst_4 = arith.constant 0.000000e+00 : f32
    %13 = vector.broadcast %cst_3 : f32 to vector<8x8x32xf32>
    %14 = vector.broadcast %cst_4 : f32 to vector<8x8x32xf32>
    %15 = arith.select %12, %13, %14 : vector<8x8x32xi1>, vector<8x8x32xf32>
    %16 = arith.addf %6, %15 : vector<8x8x32xf32>
    %cst_5 = arith.constant 0.000000e+00 : f32
    %17 = vector.shape_cast %9 : vector<8x8x1xf32> to vector<8x8x1xf32>
    %18 = vector.broadcast %17 : vector<8x8x1xf32> to vector<8x8x32xf32>
    %19 = vector.broadcast %cst_5 : f32 to vector<8x8x32xf32>
    %20 = arith.select %12, %18, %19 : vector<8x8x32xi1>, vector<8x8x32xf32>
    %21 = arith.addf %7, %20 : vector<8x8x32xf32>
    %22 = vector.extract_strided_slice %4 {offsets = [0, 8], sizes = [8, 8], strides = [1, 1]} : vector<8x32xf32> to vector<8x8xf32>
    %23 = vector.shape_cast %22 : vector<8x8xf32> to vector<8x8x1xf32>
    %24 = vector.broadcast %23 : vector<8x8x1xf32> to vector<8x8x32xf32>
    %25 = vector.broadcast %5 : vector<8x1x32xf32> to vector<8x8x32xf32>
    %26 = arith.cmpf oge, %24, %25 : vector<8x8x32xf32>
    %cst_6 = arith.constant 1.000000e+00 : f32
    %cst_7 = arith.constant 0.000000e+00 : f32
    %27 = vector.broadcast %cst_6 : f32 to vector<8x8x32xf32>
    %28 = vector.broadcast %cst_7 : f32 to vector<8x8x32xf32>
    %29 = arith.select %26, %27, %28 : vector<8x8x32xi1>, vector<8x8x32xf32>
    %30 = arith.addf %16, %29 : vector<8x8x32xf32>
    %cst_8 = arith.constant 0.000000e+00 : f32
    %31 = vector.shape_cast %23 : vector<8x8x1xf32> to vector<8x8x1xf32>
    %32 = vector.broadcast %31 : vector<8x8x1xf32> to vector<8x8x32xf32>
    %33 = vector.broadcast %cst_8 : f32 to vector<8x8x32xf32>
    %34 = arith.select %26, %32, %33 : vector<8x8x32xi1>, vector<8x8x32xf32>
    %35 = arith.addf %21, %34 : vector<8x8x32xf32>
    %36 = vector.extract_strided_slice %4 {offsets = [0, 16], sizes = [8, 8], strides = [1, 1]} : vector<8x32xf32> to vector<8x8xf32>
    %37 = vector.shape_cast %36 : vector<8x8xf32> to vector<8x8x1xf32>
    %38 = vector.broadcast %37 : vector<8x8x1xf32> to vector<8x8x32xf32>
    %39 = vector.broadcast %5 : vector<8x1x32xf32> to vector<8x8x32xf32>
    %40 = arith.cmpf oge, %38, %39 : vector<8x8x32xf32>
    %cst_9 = arith.constant 1.000000e+00 : f32
    %cst_10 = arith.constant 0.000000e+00 : f32
    %41 = vector.broadcast %cst_9 : f32 to vector<8x8x32xf32>
    %42 = vector.broadcast %cst_10 : f32 to vector<8x8x32xf32>
    %43 = arith.select %40, %41, %42 : vector<8x8x32xi1>, vector<8x8x32xf32>
    %44 = arith.addf %30, %43 : vector<8x8x32xf32>
    %cst_11 = arith.constant 0.000000e+00 : f32
    %45 = vector.shape_cast %37 : vector<8x8x1xf32> to vector<8x8x1xf32>
    %46 = vector.broadcast %45 : vector<8x8x1xf32> to vector<8x8x32xf32>
    %47 = vector.broadcast %cst_11 : f32 to vector<8x8x32xf32>
    %48 = arith.select %40, %46, %47 : vector<8x8x32xi1>, vector<8x8x32xf32>
    %49 = arith.addf %35, %48 : vector<8x8x32xf32>
    %50 = vector.extract_strided_slice %4 {offsets = [0, 24], sizes = [8, 8], strides = [1, 1]} : vector<8x32xf32> to vector<8x8xf32>
    %51 = vector.shape_cast %50 : vector<8x8xf32> to vector<8x8x1xf32>
    %52 = vector.broadcast %51 : vector<8x8x1xf32> to vector<8x8x32xf32>
    %53 = vector.broadcast %5 : vector<8x1x32xf32> to vector<8x8x32xf32>
    %54 = arith.cmpf oge, %52, %53 : vector<8x8x32xf32>
    %cst_12 = arith.constant 1.000000e+00 : f32
    %cst_13 = arith.constant 0.000000e+00 : f32
    %55 = vector.broadcast %cst_12 : f32 to vector<8x8x32xf32>
    %56 = vector.broadcast %cst_13 : f32 to vector<8x8x32xf32>
    %57 = arith.select %54, %55, %56 : vector<8x8x32xi1>, vector<8x8x32xf32>
    %58 = arith.addf %44, %57 : vector<8x8x32xf32>
    %cst_14 = arith.constant 0.000000e+00 : f32
    %59 = vector.shape_cast %51 : vector<8x8x1xf32> to vector<8x8x1xf32>
    %60 = vector.broadcast %59 : vector<8x8x1xf32> to vector<8x8x32xf32>
    %61 = vector.broadcast %cst_14 : f32 to vector<8x8x32xf32>
    %62 = arith.select %54, %60, %61 : vector<8x8x32xi1>, vector<8x8x32xf32>
    %63 = arith.addf %49, %62 : vector<8x8x32xf32>
    %cst_15 = arith.constant dense<0.000000e+00> : vector<8x32xf32>
    %64 = vector.multi_reduction <add>, %58, %cst_15 [1] : vector<8x8x32xf32> to vector<8x32xf32>
    %cst_16 = arith.constant dense<0.000000e+00> : vector<8x32xf32>
    %65 = vector.multi_reduction <add>, %63, %cst_16 [1] : vector<8x8x32xf32> to vector<8x32xf32>
    %66 = arith.mulf %64, %4 : vector<8x32xf32>
    %cst_17 = arith.constant 1.000000e+00 : f32
    %67 = vector.broadcast %cst_17 : f32 to vector<8x32xf32>
    %68 = arith.addf %67, %66 : vector<8x32xf32>
    %69 = arith.cmpf ogt, %68, %65 : vector<8x32xf32>
    %cst_18 = arith.constant 1.000000e+00 : f32
    %cst_19 = arith.constant 0.000000e+00 : f32
    %70 = vector.broadcast %cst_18 : f32 to vector<8x32xf32>
    %71 = vector.broadcast %cst_19 : f32 to vector<8x32xf32>
    %72 = arith.select %69, %70, %71 : vector<8x32xi1>, vector<8x32xf32>
    %cst_20 = arith.constant dense<0.000000e+00> : vector<8xf32>
    %73 = vector.multi_reduction <add>, %72, %cst_20 [1] : vector<8x32xf32> to vector<8xf32>
    %74 = vector.shape_cast %73 : vector<8xf32> to vector<8x1xf32>
    %cst_21 = arith.constant 0.000000e+00 : f32
    %75 = vector.broadcast %cst_21 : f32 to vector<8x32xf32>
    %76 = arith.select %69, %4, %75 : vector<8x32xi1>, vector<8x32xf32>
    %cst_22 = arith.constant dense<0.000000e+00> : vector<8xf32>
    %77 = vector.multi_reduction <add>, %76, %cst_22 [1] : vector<8x32xf32> to vector<8xf32>
    %78 = vector.shape_cast %77 : vector<8xf32> to vector<8x1xf32>
    %cst_23 = arith.constant 1.000000e+00 : f32
    %79 = vector.broadcast %cst_23 : f32 to vector<8x1xf32>
    %80 = arith.subf %78, %79 : vector<8x1xf32>
    %81 = arith.divf %80, %74 : vector<8x1xf32>
    %82 = vector.broadcast %81 : vector<8x1xf32> to vector<8x32xf32>
    %83 = arith.subf %4, %82 : vector<8x32xf32>
    %cst_24 = arith.constant 0.000000e+00 : f32
    %84 = vector.broadcast %cst_24 : f32 to vector<8x32xf32>
    %85 = arith.maximumf %83, %84 : vector<8x32xf32>
    %c0_25 = arith.constant 0 : index
    %c0_26 = arith.constant 0 : index
    %86 = vector.load %arg2[%c0_25, %c0_26] : memref<8x32xf32, #tpu.memory_space<vmem>>, vector<8x32xf32>
    tpu.vector_store %arg2[%c0_25, %c0_26], %85 {strides = array<i32>} : memref<8x32xf32, #tpu.memory_space<vmem>>, vector<8x32xf32>,
    return
  }
  func.func @transform_0(%arg0: i32) -> (i32, i32) {
    %c0_i32 = arith.constant 0 : i32
    %c0_i32_0 = arith.constant 0 : i32
    return %arg0, %c0_i32 : i32, i32
  }
  func.func @transform_1(%arg0: i32) -> (i32, i32) {
    %c0_i32 = arith.constant 0 : i32
    %c0_i32_0 = arith.constant 0 : i32
    return %arg0, %c0_i32 : i32, i32
  }
}

</mosaic_0001>

<bundles_post_ra>
// kernel: tpu_custom_call.1
= control target key start
LH: loop header
LB: loop body
LE: loop exit
PB: predicated region body
PF: predicated region fallthrough
CT: control target
= control target key end

     0   :  { %6 = vsyncpa [#allocation3], 0  ;;  %s1070_s0 = inlined_call_operand.hbm [shape: f32[8,32], index: 0, kind: input, shape index: {}]   ;;  %s1071_s1 = inlined_call_operand.hbm [shape: f32[8,32], index: 1, kind: output, shape index: {}]  }
   0x1   :  { %7 = vsyncpa [#allocation4], 0  ;;  %s727_s6 = smov [#allocation2]  }
   0x2   :  { %s14_s7 = sshll.u32 %s727_s6, 4  ;;  %s15_s7 = int_to_ptr.vmem [resolvable:$true] %s14_s7 }
   0x3   :  { %s691_s8 = scalar_lea.vmem %s15_s7, 128  ;;  %p696_p1 = scmp.lt.s32.totalorder %s15_s7, %s15_s7 }
   0x4   :  { %p692_p0 = scmp.ne.s32.totalorder %s15_s7, %s691_s8  ;;  %p697_p2 = scmp.lt.s32.totalorder %s691_s8, %s691_s8 }
   0x6   :  { %p698_p3 = por %p697_p2, %p696_p1 }
   0x8   :  { %p699_p4 = pnand %p698_p3, %p692_p0 }
   0xa   :  { %702 = shalt.err (!%p699_p4)
}
   0xb   :  { %17 = dma.hbm_to_vmem [thread:$0]  %s1070_s0, 128, %s15_s7, [#allocation3]  }
   0xc   :  { %723 = dma.done.wait [#allocation3], 128  }
   0xd   :  { %724 = vsyncadd [#allocation3], 4294967168  ;;  %vm22_vm0 = vcmask 261120   ;;  %v21_v0 = vld [vmem:[#allocation2] sm:$0xff]  ;;  %v32_v2 = vlaneseq  ;;  %v728_v3 = vmov 1966171168  }
   0xe   :  { %v23_v1 = vsel %vm22_vm0, %v21_v0, -inf  ;;  %v30_v4 = vunpack.c.l.s4 %v728_v3  ;;  %v729_v63 = vmov 0.0   ;;  %s730_s0 = smov [#allocation5]  }
   0xf   :  { %24 = vmax.xlane.f32.xlu0 %v23_v1  ;;  %v33_v5 = vshrl.u32 %v32_v2, 7  ;;  %s667_s11 = sshll.u32 %s730_s0, 4  ;;  %s668_s11 = int_to_ptr.vmem [resolvable:$true] %s667_s11 }
  0x10   :  { %v31_v6 = vunpack.c.0.s8 %v30_v4  ;;  %s703_s12 = scalar_lea.vmem %s668_s11, 128  ;;  %p708_p6 = scmp.lt.s32.totalorder %s668_s11, %s668_s11 }
  0x11   :  { %v86_v7 = vsub.s32 1, %v33_v5  ;;  %v93_v12 = vsub.s32 2, %v33_v5  ;;  %v107_v15 = vsub.s32 4, %v33_v5  ;;  %v79_v20 = vsub.s32 0, %v33_v5  ;;  %p704_p5 = scmp.ne.s32.totalorder %s668_s11, %s703_s12  ;;  %p709_p7 = scmp.lt.s32.totalorder %s703_s12, %s703_s12 }
  0x12   :  { %v34_v10 = vsub.s32 %v31_v6, %v33_v5  ;;  %v114_v25 = vsub.s32 5, %v33_v5  ;;  %v100_v40 = vsub.s32 3, %v33_v5  ;;  %v121_v43 = vsub.s32 6, %v33_v5 }
  0x13   :  { %v128_v45 = vsub.s32 7, %v33_v5  ;;  %p710_p8 = por %p709_p7, %p708_p6 }
  0x15   :  { %p711_p9 = pnand %p710_p8, %p704_p5 }
  0x98   :  { %v25_v8 = vpop.xlane.xlu0 %24 }
  0x99   :  { %v745_v9 = vsub.f32 %v21_v0, %v25_v8 }
  0x9b   :  { %v87_v11 = vrot.slane %v745_v9, %v86_v7  ;;  %v35_v13 = vrot.slane %v745_v9, %v34_v10  ;;  %v28_v14 = vcombine.high %v745_v9, %v745_v9  ;;  %v94_v16 = vrot.slane %v745_v9, %v93_v12 }
  0x9c   :  { %v108_v24 = vrot.slane %v745_v9, %v107_v15  ;;  %v115_v38 = vrot.slane %v745_v9, %v114_v25  ;;  %v80_v39 = vrot.slane %v745_v9, %v79_v20  ;;  %v101_v42 = vrot.slane %v745_v9, %v100_v40 }
  0x9d   :  { %219 = vbcast.lane.b32.xlu1 %v87_v11, 264  ;;  %89 = vbcast.lane.b32.xlu0 %v87_v11, 256  ;;  %v43_v17 = vcombine.high %v35_v13, %v35_v13  ;;  %v51_v18 = vrot.slane %v35_v13, %v34_v10  ;;  %v42_v19 = vrot.slane %v28_v14, %v34_v10  ;;  %v541_v6 = vrot.slane %v745_v9, 1 }
  0x9e   :  { %v122_v44 = vrot.slane %v745_v9, %v121_v43  ;;  %v129_v46 = vrot.slane %v745_v9, %v128_v45  ;;  %v542_v7 = vrot.slane %v745_v9, 2  ;;  %v543_v8 = vrot.slane %v745_v9, 3 }
  0x9f   :  { %v65_v21 = vrot.slane %v43_v17, %v34_v10  ;;  %v73_v22 = vcombine.high %v51_v18, %v51_v18  ;;  %v58_v23 = vrot.slane %v42_v19, %v34_v10  ;;  %v44_v26 = vcombine.high %v42_v19, %v42_v19 }
  0xa0   :  { %v753_v27 = vrot.slane %v51_v18, %v79_v20  ;;  %v545_v14 = vrot.slane %v745_v9, 5  ;;  %v546_v15 = vrot.slane %v745_v9, 6 }
  0xa1   :  { %96 = vbcast.lane.b32.xlu1 %v94_v16, 256  ;;  %291 = vbcast.lane.b32.xlu0 %v87_v11, 272  ;;  %v755_v28 = vrot.slane %v65_v21, %v79_v20  ;;  %v757_v29 = vrot.slane %v73_v22, %v79_v20  ;;  %v759_v30 = vrot.slane %v58_v23, %v79_v20 }
  0xa2   :  { %v75_v31 = vcombine.high %v65_v21, %v65_v21  ;;  %v72_v32 = vrot.slane %v44_v26, %v34_v10  ;;  %v74_v33 = vcombine.high %v58_v23, %v58_v23  ;;  %v544_v10 = vrot.slane %v745_v9, 4 }
  0xa4   :  { %v761_v34 = vrot.slane %v75_v31, %v79_v20  ;;  %v763_v35 = vrot.slane %v72_v32, %v79_v20  ;;  %v765_v36 = vrot.slane %v74_v33, %v79_v20  ;;  %v76_v37 = vcombine.high %v72_v32, %v72_v32 }
  0xa5   :  { %223 = vbcast.lane.b32.xlu1 %v94_v16, 264  ;;  %231 = vbcast.lane.b32.xlu0 %v108_v24, 264 }
  0xa6   :  { %v769_v41 = vrot.slane %v76_v37, %v79_v20  ;;  %v547_v20 = vrot.slane %v745_v9, 7 }
  0xa9   :  { %117 = vbcast.lane.b32.xlu0 %v115_v38, 256  ;;  %82 = vbcast.lane.b32.xlu1 %v80_v39, 256 }
  0xad   :  { %287 = vbcast.lane.b32.xlu0 %v80_v39, 272  ;;  %103 = vbcast.lane.b32.xlu1 %v101_v42, 256 }
  0xb1   :  { %363 = vbcast.lane.b32.xlu0 %v87_v11, 280  ;;  %215 = vbcast.lane.b32.xlu1 %v80_v39, 264 }
  0xb5   :  { %239 = vbcast.lane.b32.xlu0 %v122_v44, 264  ;;  %227 = vbcast.lane.b32.xlu1 %v101_v42, 264 }
  0xb9   :  { %367 = vbcast.lane.b32.xlu0 %v94_v16, 280  ;;  %110 = vbcast.lane.b32.xlu1 %v108_v24, 256 }
  0xbd   :  { %243 = vbcast.lane.b32.xlu0 %v129_v46, 264  ;;  %295 = vbcast.lane.b32.xlu1 %v94_v16, 272 }
  0xc1   :  { %359 = vbcast.lane.b32.xlu0 %v80_v39, 280  ;;  %235 = vbcast.lane.b32.xlu1 %v115_v38, 264 }
  0xc5   :  { %311 = vbcast.lane.b32.xlu0 %v122_v44, 272  ;;  %299 = vbcast.lane.b32.xlu1 %v101_v42, 272 }
  0xc9   :  { %315 = vbcast.lane.b32.xlu0 %v129_v46, 272  ;;  %124 = vbcast.lane.b32.xlu1 %v122_v44, 256 }
  0xcd   :  { %383 = vbcast.lane.b32.xlu0 %v122_v44, 280  ;;  %303 = vbcast.lane.b32.xlu1 %v108_v24, 272 }
  0xd1   :  { %131 = vbcast.lane.b32.xlu1 %v129_v46, 256 }
  0xd5   :  { %307 = vbcast.lane.b32.xlu1 %v115_v38, 272 }
  0xd9   :  { %371 = vbcast.lane.b32.xlu1 %v101_v42, 280 }
  0xdd   :  { %375 = vbcast.lane.b32.xlu1 %v108_v24, 280 }
  0xe1   :  { %379 = vbcast.lane.b32.xlu1 %v115_v38, 280 }
  0xe5   :  { %387 = vbcast.lane.b32.xlu1 %v129_v46, 280 }
 0x10f   :  { %v220_v47 = vpop.permute.xlu1 %219  ;;  %v90_v48 = vpop.permute.xlu0 %89 }
 0x110   :  { %vm246_vm1 = vcmp.ge.f32.partialorder %v220_v47, %v755_v28  ;;  %vm174_vm2 = vcmp.ge.f32.partialorder %v90_v48, %v755_v28 }
 0x111   :  { %v270_v49 = vsel %vm246_vm1, %v220_v47, 0.0  ;;  %v198_v50 = vsel %vm174_vm2, %v90_v48, 0.0  ;;  %v254_v0 = vsel %vm246_vm1, 1.0, %v729_v63  ;;  %v182_v1 = vsel %vm174_vm2, 1.0, %v729_v63 }
 0x112   :  { %v278_v51 = vadd.f32 %v270_v49, %v198_v50  ;;  %v262_v5 = vadd.f32 %v254_v0, %v182_v1 }
 0x113   :  { %v97_v52 = vpop.permute.xlu1 %96  ;;  %v292_v53 = vpop.permute.xlu0 %291 }
 0x114   :  { %vm175_vm3 = vcmp.ge.f32.partialorder %v97_v52, %v757_v29  ;;  %vm318_vm4 = vcmp.ge.f32.partialorder %v292_v53, %v755_v28 }
 0x115   :  { %v199_v54 = vsel %vm175_vm3, %v97_v52, 0.0  ;;  %v342_v55 = vsel %vm318_vm4, %v292_v53, 0.0  ;;  %v326_v4 = vsel %vm318_vm4, 1.0, %v729_v63  ;;  %v183_v17 = vsel %vm175_vm3, 1.0, %v729_v63 }
 0x116   :  { %v350_v56 = vadd.f32 %v342_v55, %v278_v51  ;;  %v334_v11 = vadd.f32 %v326_v4, %v262_v5 }
 0x117   :  { %v224_v57 = vpop.permute.xlu1 %223  ;;  %v232_v58 = vpop.permute.xlu0 %231 }
 0x118   :  { %vm247_vm5 = vcmp.ge.f32.partialorder %v224_v57, %v757_v29  ;;  %vm249_vm6 = vcmp.ge.f32.partialorder %v232_v58, %v759_v30 }
 0x119   :  { %v271_v59 = vsel %vm247_vm5, %v224_v57, 0.0  ;;  %v255_v16 = vsel %vm247_vm5, 1.0, %v729_v63  ;;  %v257_v21 = vsel %vm249_vm6, 1.0, %v729_v63  ;;  %v819_v22 = vsel %vm249_vm6, %v232_v58, 0.0 }
 0x11a   :  { %v789_v60 = vadd.f32 %v271_v59, %v199_v54  ;;  %v263_v25 = vadd.f32 %v255_v16, %v183_v17 }
 0x11b   :  { %v118_v61 = vpop.permute.xlu0 %117  ;;  %v83_v62 = vpop.permute.xlu1 %82 }
 0x11c   :  { %vm173_vm7 = vcmp.ge.f32.partialorder %v83_v62, %v753_v27  ;;  %vm178_vm10 = vcmp.ge.f32.partialorder %v118_v61, %v763_v35 }
 0x11d   :  { %v181_v26 = vsel %vm173_vm7, 1.0, %v729_v63  ;;  %v836_v42 = vsel %vm178_vm10, 1.0, %v729_v63  ;;  %v838_v43 = vsel %vm178_vm10, %v118_v61, 0.0  ;;  %v197_v44 = vsel %vm173_vm7, %v83_v62, 0.0 }
 0x11f   :  { %v288_v2 = vpop.permute.xlu0 %287  ;;  %v104_v3 = vpop.permute.xlu1 %103 }
 0x120   :  { %vm317_vm11 = vcmp.ge.f32.partialorder %v288_v2, %v753_v27  ;;  %vm176_vm12 = vcmp.ge.f32.partialorder %v104_v3, %v761_v34 }
 0x121   :  { %v325_v51 = vsel %vm317_vm11, 1.0, %v729_v63  ;;  %v341_v52 = vsel %vm317_vm11, %v288_v2, 0.0  ;;  %v184_v53 = vsel %vm176_vm12, 1.0, %v729_v63  ;;  %v200_v58 = vsel %vm176_vm12, %v104_v3, 0.0 }
 0x123   :  { %v364_v12 = vpop.permute.xlu0 %363  ;;  %v216_v13 = vpop.permute.xlu1 %215 }
 0x124   :  { %vm390_vm8 = vcmp.ge.f32.partialorder %v364_v12, %v755_v28  ;;  %vm245_vm9 = vcmp.ge.f32.partialorder %v216_v13, %v753_v27 }
 0x125   :  { %v398_v18 = vsel %vm390_vm8, 1.0, %v729_v63  ;;  %v414_v19 = vsel %vm390_vm8, %v364_v12, 0.0  ;;  %v253_v28 = vsel %vm245_vm9, 1.0, %v729_v63  ;;  %v269_v38 = vsel %vm245_vm9, %v216_v13, 0.0 }
 0x126   :  { %v406_v23 = vadd.f32 %v398_v18, %v334_v11  ;;  %v422_v24 = vadd.f32 %v414_v19, %v350_v56  ;;  %v261_v45 = vadd.f32 %v253_v28, %v181_v26  ;;  %v277_v48 = vadd.f32 %v269_v38, %v197_v44 }
 0x127   :  { %v240_v31 = vpop.permute.xlu0 %239  ;;  %v228_v32 = vpop.permute.xlu1 %227 }
 0x128   :  { %v436_v33 = vsel %vm22_vm0, %v406_v23, 0.0  ;;  %v492_v37 = vsel %vm22_vm0, %v422_v24, 0.0  ;;  %vm248_vm13 = vcmp.ge.f32.partialorder %v228_v32, %v761_v34  ;;  %vm251_vm14 = vcmp.ge.f32.partialorder %v240_v31, %v765_v36 }
 0x129   :  { %v437_v39 = vrot.slane %v436_v33, 4  ;;  %v493_v40 = vrot.slane %v492_v37, 4  ;;  %v256_v54 = vsel %vm248_vm13, 1.0, %v729_v63  ;;  %v272_v57 = vsel %vm248_vm13, %v228_v32, 0.0 }
 0x12a   :  { %v860_v59 = vsel %vm251_vm14, 1.0, %v729_v63  ;;  %v862_v61 = vsel %vm251_vm14, %v240_v31, 0.0  ;;  %v333_v4 = vadd.f32 %v325_v51, %v261_v45  ;;  %v349_v5 = vadd.f32 %v341_v52, %v277_v48 }
 0x12b   :  { %v438_v46 = vadd.f32 %v437_v39, %v436_v33  ;;  %v494_v47 = vadd.f32 %v493_v40, %v492_v37  ;;  %v368_v49 = vpop.permute.xlu0 %367  ;;  %v111_v50 = vpop.permute.xlu1 %110  ;;  %v865_v11 = vadd.f32 %v256_v54, %v184_v53  ;;  %v867_v12 = vadd.f32 %v272_v57, %v200_v58 }
 0x12c   :  { %vm177_vm15 = vcmp.ge.f32.partialorder %v111_v50, %v759_v30  ;;  %vm391_vm1 = vcmp.ge.f32.partialorder %v368_v49, %v757_v29 }
 0x12d   :  { %v439_v55 = vrot.slane %v438_v46, 2  ;;  %v495_v56 = vrot.slane %v494_v47, 2  ;;  %v185_v3 = vsel %vm177_vm15, 1.0, %v729_v63  ;;  %v399_v16 = vsel %vm391_vm1, 1.0, %v729_v63 }
 0x12e   :  { %v201_v17 = vsel %vm177_vm15, %v111_v50, 0.0  ;;  %v415_v19 = vsel %vm391_vm1, %v368_v49, 0.0  ;;  %v882_v28 = vadd.f32 %v257_v21, %v185_v3  ;;  %vm597_vm15 = vcmask 1041409  }
 0x12f   :  { %v440_v62 = vadd.f32 %v439_v55, %v438_v46  ;;  %v496_v0 = vadd.f32 %v495_v56, %v494_v47  ;;  %v244_v1 = vpop.permute.xlu0 %243  ;;  %v296_v2 = vpop.permute.xlu1 %295  ;;  %v886_v38 = vadd.f32 %v819_v22, %v201_v17 }
 0x130   :  { %vm319_vm2 = vcmp.ge.f32.partialorder %v296_v2, %v757_v29  ;;  %vm252_vm3 = vcmp.ge.f32.partialorder %v244_v1, %v769_v41 }
 0x131   :  { %v441_v13 = vrot.slane %v440_v62, 1  ;;  %v497_v18 = vrot.slane %v496_v0, 1  ;;  %v327_v23 = vsel %vm319_vm2, 1.0, %v729_v63  ;;  %v343_v24 = vsel %vm319_vm2, %v296_v2, 0.0 }
 0x132   :  { %v335_v31 = vadd.f32 %v327_v23, %v263_v25  ;;  %v351_v32 = vadd.f32 %v343_v24, %v789_v60  ;;  %v891_v39 = vsel %vm252_vm3, 1.0, %v729_v63  ;;  %v908_v55 = vsel %vm252_vm3, %v244_v1, 0.0 }
 0x133   :  { %v442_v26 = vadd.f32 %v441_v13, %v440_v62  ;;  %v360_v33 = vpop.permute.xlu0 %359  ;;  %v236_v37 = vpop.permute.xlu1 %235  ;;  %v498_v40 = vadd.f32 %v497_v18, %v496_v0 }
 0x134   :  { %vm389_vm4 = vcmp.ge.f32.partialorder %v360_v33, %v753_v27  ;;  %vm250_vm5 = vcmp.ge.f32.partialorder %v236_v37, %v763_v35  ;;  %v407_v21 = vadd.f32 %v399_v16, %v335_v31  ;;  %v423_v25 = vadd.f32 %v415_v19, %v351_v32 }
 0x135   :  { %v557_v29 = vmul.f32 %v541_v6, %v442_v26  ;;  %v397_v60 = vsel %vm389_vm4, 1.0, %v729_v63  ;;  %v413_v22 = vsel %vm389_vm4, %v360_v33, 0.0  ;;  %v258_v45 = vsel %vm250_vm5, 1.0, %v729_v63 }
 0x136   :  { %v405_v44 = vadd.f32 %v397_v60, %v333_v4  ;;  %v443_v47 = vsel %vm22_vm0, %v407_v21, 0.0  ;;  %v499_v27 = vsel %vm22_vm0, %v423_v25, 0.0  ;;  %v421_v48 = vadd.f32 %v413_v22, %v349_v5 }
 0x137   :  { %v565_v46 = vadd.f32 1.0, %v557_v29  ;;  %v312_v49 = vpop.permute.xlu0 %311  ;;  %v300_v50 = vpop.permute.xlu1 %299  ;;  %v444_v51 = vrot.slane %v443_v47, 4  ;;  %v500_v52 = vrot.slane %v499_v27, 4  ;;  %v274_v54 = vsel %vm250_vm5, %v236_v37, 0.0 }
 0x138   :  { %v429_v53 = vsel %vm22_vm0, %v405_v44, 0.0  ;;  %v485_v57 = vsel %vm22_vm0, %v421_v48, 0.0  ;;  %v919_v3 = vadd.f32 %v258_v45, %v836_v42  ;;  %v922_v1 = vadd.f32 %v274_v54, %v838_v43 }
 0x139   :  { %vm573_vm6 = vcmp.gt.f32.partialorder %v565_v46, %v498_v40  ;;  %v430_v56 = vrot.slane %v429_v53, 4  ;;  %v445_v0 = vadd.f32 %v444_v51, %v443_v47  ;;  %v501_v2 = vadd.f32 %v500_v52, %v499_v27 }
 0x13a   :  { %v912_v58 = vsel %vm573_vm6, 1.0, %v729_v63  ;;  %v916_v62 = vsel %vm573_vm6, %v541_v6, 0.0  ;;  %v486_v5 = vrot.slane %v485_v57, 4  ;;  %vm323_vm7 = vcmp.ge.f32.partialorder %v312_v49, %v765_v36 }
 0x13b   :  { %v431_v4 = vadd.f32 %v430_v56, %v429_v53  ;;  %v316_v13 = vpop.permute.xlu0 %315  ;;  %v125_v16 = vpop.permute.xlu1 %124  ;;  %v446_v17 = vrot.slane %v445_v0, 2  ;;  %v502_v18 = vrot.slane %v501_v2, 2  ;;  %vm320_vm8 = vcmp.ge.f32.partialorder %v300_v50, %v761_v34 }
 0x13c   :  { %v596_v6 = vrot.slane %v912_v58, 7  ;;  %v637_v19 = vrot.slane %v916_v62, 7  ;;  %v487_v24 = vadd.f32 %v486_v5, %v485_v57  ;;  %v328_v31 = vsel %vm320_vm8, 1.0, %v729_v63 }
 0x13d   :  { %v432_v23 = vrot.slane %v431_v4, 2  ;;  %v447_v26 = vadd.f32 %v446_v17, %v445_v0  ;;  %v503_v42 = vadd.f32 %v502_v18, %v501_v2  ;;  %v344_v43 = vsel %vm320_vm8, %v300_v50, 0.0 }
 0x13e   :  { %v488_v33 = vrot.slane %v487_v24, 2  ;;  %v331_v37 = vsel %vm323_vm7, 1.0, %v729_v63  ;;  %v347_v29 = vsel %vm323_vm7, %v312_v49, 0.0  ;;  %vm324_vm9 = vcmp.ge.f32.partialorder %v316_v13, %v769_v41 }
 0x13f   :  { %v433_v32 = vadd.f32 %v432_v23, %v431_v4  ;;  %v304_v21 = vpop.permute.xlu1 %303  ;;  %v448_v25 = vrot.slane %v447_v26, 1  ;;  %v504_v60 = vrot.slane %v503_v42, 1  ;;  %vm179_vm10 = vcmp.ge.f32.partialorder %v125_v16, %v765_v36  ;;  %v384_v46 = vpop.permute.xlu0 %383 }
 0x140   :  { %v489_v44 = vadd.f32 %v488_v33, %v487_v24  ;;  %v336_v22 = vadd.f32 %v328_v31, %v865_v11  ;;  %v934_v45 = vadd.f32 %v344_v43, %v867_v12  ;;  %v332_v27 = vsel %vm324_vm9, 1.0, %v729_v63 }
 0x141   :  { %v434_v40 = vrot.slane %v433_v32, 1  ;;  %v449_v47 = vadd.f32 %v448_v25, %v447_v26  ;;  %v187_v48 = vsel %vm179_vm10, 1.0, %v729_v63  ;;  %v203_v49 = vsel %vm179_vm10, %v125_v16, 0.0 }
 0x142   :  { %v490_v51 = vrot.slane %v489_v44, 1  ;;  %v267_v52 = vadd.f32 %v860_v59, %v187_v48  ;;  %v283_v53 = vadd.f32 %v862_v61, %v203_v49  ;;  %v505_v11 = vadd.f32 %v504_v60, %v503_v42 }
 0x143   :  { %v435_v50 = vadd.f32 %v434_v40, %v433_v32  ;;  %v132_v54 = vpop.permute.xlu1 %131  ;;  %v558_v12 = vmul.f32 %v542_v7, %v449_v47  ;;  %vm395_vm11 = vcmp.ge.f32.partialorder %v384_v46, %v765_v36  ;;  %vm321_vm12 = vcmp.ge.f32.partialorder %v304_v21, %v759_v30 }
 0x144   :  { %v339_v57 = vadd.f32 %v331_v37, %v267_v52  ;;  %v355_v0 = vadd.f32 %v347_v29, %v283_v53  ;;  %vm180_vm13 = vcmp.ge.f32.partialorder %v132_v54, %v769_v41  ;;  %v948_v4 = vadd.f32 %v490_v51, %v489_v44 }
 0x145   :  { %v556_v56 = vmul.f32 %v435_v50, %v745_v9  ;;  %v566_v2 = vadd.f32 1.0, %v558_v12  ;;  %v403_v59 = vsel %vm395_vm11, 1.0, %v729_v63  ;;  %v419_v61 = vsel %vm395_vm11, %v384_v46, 0.0 }
 0x146   :  { %v411_v16 = vadd.f32 %v403_v59, %v339_v57  ;;  %v427_v17 = vadd.f32 %v419_v61, %v355_v0  ;;  %v329_v36 = vsel %vm321_vm12, 1.0, %v729_v63  ;;  %v348_v23 = vsel %vm324_vm9, %v316_v13, 0.0 }
 0x147   :  { %v951_v5 = vadd.f32 1.0, %v556_v56  ;;  %v308_v18 = vpop.permute.xlu1 %307  ;;  %vm574_vm14 = vcmp.gt.f32.partialorder %v566_v2, %v505_v11  ;;  %v345_v24 = vsel %vm321_vm12, %v304_v21, 0.0  ;;  %v188_v26 = vsel %vm180_vm13, 1.0, %v729_v63 }
 0x148   :  { %v964_v42 = vsel %vm574_vm14, 1.0, %v729_v63  ;;  %v968_v31 = vsel %vm574_vm14, %v542_v7, 0.0  ;;  %v471_v13 = vsel %vm22_vm0, %v411_v16, 0.0  ;;  %v337_v33 = vadd.f32 %v329_v36, %v882_v28 }
 0x149   :  { %vm572_vm1 = vcmp.gt.f32.partialorder %v951_v5, %v948_v4  ;;  %v599_v43 = vrot.slane %v964_v42, 6  ;;  %v639_v32 = vrot.slane %v968_v31, 6  ;;  %v204_v37 = vsel %vm180_vm13, %v132_v54, 0.0 }
 0x14a   :  { %v621_v7 = vsel %vm572_vm1, %v745_v9, 0.0  ;;  %v472_v29 = vrot.slane %v471_v13, 4  ;;  %v527_v21 = vsel %vm22_vm0, %v427_v17, 0.0  ;;  %v268_v25 = vadd.f32 %v891_v39, %v188_v26 }
 0x14b   :  { %v372_v60 = vpop.permute.xlu1 %371  ;;  %v528_v40 = vrot.slane %v527_v21, 4  ;;  %v353_v44 = vadd.f32 %v345_v24, %v886_v38  ;;  %vm322_vm2 = vcmp.ge.f32.partialorder %v308_v18, %v763_v35  ;;  %v284_v50 = vadd.f32 %v908_v55, %v204_v37 }
 0x14c   :  { %vm392_vm3 = vcmp.ge.f32.partialorder %v372_v60, %v761_v34  ;;  %v473_v28 = vadd.f32 %v472_v29, %v471_v13  ;;  %v330_v46 = vsel %vm322_vm2, 1.0, %v729_v63  ;;  %v346_v47 = vsel %vm322_vm2, %v308_v18, 0.0 }
 0x14d   :  { %v400_v48 = vsel %vm392_vm3, 1.0, %v729_v63  ;;  %v529_v49 = vadd.f32 %v528_v40, %v527_v21  ;;  %v338_v51 = vadd.f32 %v330_v46, %v919_v3  ;;  %v354_v53 = vadd.f32 %v346_v47, %v922_v1 }
 0x14e   :  { %v408_v39 = vadd.f32 %v400_v48, %v336_v22  ;;  %v474_v52 = vrot.slane %v473_v28, 2  ;;  %v416_v38 = vsel %vm392_vm3, %v372_v60, 0.0  ;;  %v340_v11 = vadd.f32 %v332_v27, %v268_v25 }
 0x14f   :  { %v376_v54 = vpop.permute.xlu1 %375  ;;  %v530_v12 = vrot.slane %v529_v49, 2  ;;  %v424_v34 = vadd.f32 %v416_v38, %v934_v45  ;;  %v1000_v45 = vsel %vm597_vm15, %v637_v19, %v621_v7  ;;  %v356_v18 = vadd.f32 %v348_v23, %v284_v50 }
 0x150   :  { %v450_v56 = vsel %vm22_vm0, %v408_v39, 0.0  ;;  %vm393_vm4 = vcmp.ge.f32.partialorder %v376_v54, %v759_v30  ;;  %v475_v57 = vadd.f32 %v474_v52, %v473_v28  ;;  %vm600_vm7 = vcmask 1042434  }
 0x151   :  { %v451_v0 = vrot.slane %v450_v56, 4  ;;  %v401_v55 = vsel %vm393_vm4, 1.0, %v729_v63  ;;  %v417_v2 = vsel %vm393_vm4, %v376_v54, 0.0  ;;  %v531_v3 = vadd.f32 %v530_v12, %v529_v49 }
 0x152   :  { %v506_v22 = vsel %vm22_vm0, %v424_v34, 0.0  ;;  %v409_v59 = vadd.f32 %v401_v55, %v337_v33  ;;  %v425_v1 = vadd.f32 %v417_v2, %v353_v44  ;;  %v476_v61 = vrot.slane %v475_v57, 1 }
 0x153   :  { %v452_v16 = vadd.f32 %v451_v0, %v450_v56  ;;  %v507_v27 = vrot.slane %v506_v22, 4  ;;  %v380_v17 = vpop.permute.xlu1 %379  ;;  %v532_v37 = vrot.slane %v531_v3, 1  ;;  %vm603_vm8 = vcmask 1043459  }
 0x154   :  { %v457_v30 = vsel %vm22_vm0, %v409_v59, 0.0  ;;  %v513_v36 = vsel %vm22_vm0, %v425_v1, 0.0  ;;  %vm394_vm5 = vcmp.ge.f32.partialorder %v380_v17, %v763_v35  ;;  %v477_v24 = vadd.f32 %v476_v61, %v475_v57 }
 0x155   :  { %v453_v26 = vrot.slane %v452_v16, 2  ;;  %v508_v13 = vadd.f32 %v507_v27, %v506_v22  ;;  %v458_v33 = vrot.slane %v457_v30, 4  ;;  %v514_v29 = vrot.slane %v513_v36, 4 }
 0x156   :  { %v402_v21 = vsel %vm394_vm5, 1.0, %v729_v63  ;;  %v418_v25 = vsel %vm394_vm5, %v380_v17, 0.0  ;;  %v562_v35 = vmul.f32 %v546_v15, %v477_v24  ;;  %vm606_vm9 = vcmask 1044484  }
 0x157   :  { %v454_v62 = vadd.f32 %v453_v26, %v452_v16  ;;  %v509_v60 = vrot.slane %v508_v13, 2  ;;  %v459_v19 = vadd.f32 %v458_v33, %v457_v30  ;;  %v410_v7 = vadd.f32 %v402_v21, %v338_v51  ;;  %v388_v40 = vpop.permute.xlu1 %387 }
 0x158   :  { %v515_v44 = vadd.f32 %v514_v29, %v513_v36  ;;  %v426_v28 = vadd.f32 %v418_v25, %v354_v53  ;;  %vm396_vm6 = vcmp.ge.f32.partialorder %v388_v40, %v769_v41  ;;  %v533_v36 = vadd.f32 %v532_v37, %v531_v3 }
 0x159   :  { %v455_v23 = vrot.slane %v454_v62, 1  ;;  %v510_v46 = vadd.f32 %v509_v60, %v508_v13  ;;  %v460_v47 = vrot.slane %v459_v19, 2  ;;  %v464_v48 = vsel %vm22_vm0, %v410_v7, 0.0 }
 0x15a   :  { %v516_v49 = vrot.slane %v515_v44, 2  ;;  %v465_v50 = vrot.slane %v464_v48, 4  ;;  %v520_v39 = vsel %vm22_vm0, %v426_v28, 0.0  ;;  %v404_v51 = vsel %vm396_vm6, 1.0, %v729_v63 }
 0x15b   :  { %v456_v52 = vadd.f32 %v455_v23, %v454_v62  ;;  %v511_v53 = vrot.slane %v510_v46, 1  ;;  %v461_v38 = vadd.f32 %v460_v47, %v459_v19  ;;  %v521_v54 = vrot.slane %v520_v39, 4 }
 0x15c   :  { %v517_v12 = vadd.f32 %v516_v49, %v515_v44  ;;  %v466_v34 = vadd.f32 %v465_v50, %v464_v48  ;;  %v412_v56 = vadd.f32 %v404_v51, %v340_v11  ;;  %v420_v57 = vsel %vm396_vm6, %v388_v40, 0.0 }
 0x15d   :  { %v512_v0 = vadd.f32 %v511_v53, %v510_v46  ;;  %v559_v55 = vmul.f32 %v543_v8, %v456_v52  ;;  %v462_v2 = vrot.slane %v461_v38, 1  ;;  %v522_v22 = vadd.f32 %v521_v54, %v520_v39 }
 0x15e   :  { %v518_v59 = vrot.slane %v517_v12, 1  ;;  %v467_v1 = vrot.slane %v466_v34, 2  ;;  %v428_v61 = vadd.f32 %v420_v57, %v356_v18  ;;  %v478_v16 = vsel %vm22_vm0, %v412_v56, 0.0 }
 0x15f   :  { %v567_v27 = vadd.f32 1.0, %v559_v55  ;;  %v463_v17 = vadd.f32 %v462_v2, %v461_v38  ;;  %v523_v30 = vrot.slane %v522_v22, 2  ;;  %v479_v11 = vrot.slane %v478_v16, 4 }
 0x160   :  { %v468_v41 = vadd.f32 %v467_v1, %v466_v34  ;;  %v534_v24 = vsel %vm22_vm0, %v428_v61, 0.0  ;;  %v570_v26 = vadd.f32 1.0, %v562_v35  ;;  %v519_v19 = vadd.f32 %v518_v59, %v517_v12 }
 0x161   :  { %vm575_vm10 = vcmp.gt.f32.partialorder %v567_v27, %v512_v0  ;;  %v560_v13 = vmul.f32 %v544_v10, %v463_v17  ;;  %v524_v33 = vadd.f32 %v523_v30, %v522_v22  ;;  %v480_v29 = vadd.f32 %v479_v11, %v478_v16 }
 0x162   :  { %v583_v18 = vsel %vm575_vm10, 1.0, %v729_v63  ;;  %v624_v21 = vsel %vm575_vm10, %v543_v8, 0.0  ;;  %v469_v25 = vrot.slane %v468_v41, 1  ;;  %v535_v62 = vrot.slane %v534_v24, 4 }
 0x163   :  { %v641_v60 = vrot.slane %v624_v21, 5  ;;  %v568_v3 = vadd.f32 1.0, %v560_v13  ;;  %v525_v37 = vrot.slane %v524_v33, 1  ;;  %vm609_vm11 = vcmask 1045509  }
 0x164   :  { %v580_v7 = vsel %vm572_vm1, 1.0, %v729_v63  ;;  %v470_v40 = vadd.f32 %v469_v25, %v468_v41  ;;  %v481_v44 = vrot.slane %v480_v29, 2  ;;  %v536_v28 = vadd.f32 %v535_v62, %v534_v24 }
 0x165   :  { %v602_v35 = vrot.slane %v583_v18, 5  ;;  %vm576_vm12 = vcmp.gt.f32.partialorder %v568_v3, %v519_v19  ;;  %vm578_vm13 = vcmp.gt.f32.partialorder %v570_v26, %v533_v36  ;;  %v640_v8 = vsel %vm600_vm7, %v639_v32, %v1000_v45 }
 0x166   :  { %v584_v23 = vsel %vm576_vm12, 1.0, %v729_v63  ;;  %v625_v46 = vsel %vm576_vm12, %v544_v10, 0.0  ;;  %v561_v4 = vmul.f32 %v545_v14, %v470_v40  ;;  %v482_v5 = vadd.f32 %v481_v44, %v480_v29 }
 0x167   :  { %v526_v47 = vadd.f32 %v525_v37, %v524_v33  ;;  %v537_v48 = vrot.slane %v536_v28, 2  ;;  %v642_v49 = vsel %vm603_vm8, %v641_v60, %v640_v8  ;;  %v643_v50 = vrot.slane %v625_v46, 4 }
 0x168   :  { %v569_v39 = vadd.f32 1.0, %v561_v4  ;;  %v483_v51 = vrot.slane %v482_v5, 1  ;;  %v627_v31 = vsel %vm578_vm13, %v546_v15, 0.0  ;;  %v598_v32 = vsel %vm597_vm15, %v596_v6, %v580_v7 }
 0x169   :  { %v538_v10 = vadd.f32 %v537_v48, %v536_v28  ;;  %v644_v45 = vsel %vm606_vm9, %v643_v50, %v642_v49  ;;  %v601_v52 = vsel %vm600_vm7, %v599_v43, %v598_v32  ;;  %v605_v53 = vrot.slane %v584_v23, 4 }
 0x16a   :  { %v484_v38 = vadd.f32 %v483_v51, %v482_v5  ;;  %vm577_vm14 = vcmp.gt.f32.partialorder %v569_v39, %v526_v47  ;;  %v586_v54 = vsel %vm578_vm13, 1.0, %v729_v63  ;;  %v604_v12 = vsel %vm603_vm8, %v602_v35, %v601_v52 }
 0x16b   :  { %v539_v15 = vrot.slane %v538_v10, 1  ;;  %v626_v58 = vsel %vm577_vm14, %v545_v14, 0.0  ;;  %v585_v6 = vsel %vm577_vm14, 1.0, %v729_v63  ;;  %v607_v34 = vsel %vm606_vm9, %v605_v53, %v604_v12 }
 0x16c   :  { %v563_v42 = vmul.f32 %v547_v20, %v484_v38  ;;  %vm612_vm15 = vcmask 1046534   ;;  %v645_v43 = vrot.slane %v626_v58, 3  ;;  %v608_v56 = vrot.slane %v585_v6, 3 }
 0x16d   :  { %v647_v57 = vrot.slane %v627_v31, 2  ;;  %v611_v0 = vrot.slane %v586_v54, 2  ;;  %v540_v55 = vadd.f32 %v539_v15, %v538_v10  ;;  %vm615_vm2 = vcmask 1047559  }
 0x16e   :  { %v571_v2 = vadd.f32 1.0, %v563_v42  ;;  %v646_v22 = vsel %vm609_vm11, %v645_v43, %v644_v45  ;;  %v610_v59 = vsel %vm609_vm11, %v608_v56, %v607_v34 }
 0x16f   :  { %v648_v1 = vsel %vm612_vm15, %v647_v57, %v646_v22  ;;  %v613_v14 = vsel %vm612_vm15, %v611_v0, %v610_v59 }
 0x170   :  { %vm579_vm1 = vcmp.gt.f32.partialorder %v571_v2, %v540_v55 }
 0x171   :  { %v628_v61 = vsel %vm579_vm1, %v547_v20, 0.0  ;;  %v587_v16 = vsel %vm579_vm1, 1.0, %v729_v63 }
 0x172   :  { %v649_v27 = vrot.slane %v628_v61, 1  ;;  %v614_v17 = vrot.slane %v587_v16, 1 }
 0x174   :  { %v650_v30 = vsel %vm615_vm2, %v649_v27, %v648_v1  ;;  %v616_v11 = vsel %vm615_vm2, %v614_v17, %v613_v14 }
 0x175   :  { %v652_v36 = vsel %vm22_vm0, %v650_v30, 0.0  ;;  %v618_v41 = vsel %vm22_vm0, %v616_v11, 0.0 }
 0x176   :  { %653 = vadd.xlane.f32.xlu1 %v652_v36  ;;  %619 = vadd.xlane.f32.xlu0 %v618_v41 }
 0x1ff   :  { %v620_v24 = vpop.xlane.xlu0 %619  ;;  %v654_v26 = vpop.xlane.xlu1 %653 }
 0x200   :  { %681 = vrcp.f32 %v620_v24  ;;  %v676_v13 = vadd.f32 -1.0, %v654_v26 }
 0x20d   :  { %v682_v33 = vpop.eup %681 }
 0x20e   :  { %v657_v29 = vmul.f32 %v682_v33, %v676_v13 }
 0x210   :  { %v658_v63 = vsub.f32 %v745_v9, %v657_v29 }
 0x212   :  { %v659_v20 = vmax.f32 %v658_v63, 0.0 }
 0x214   :  { %660 = vst.msk [vmem:[#allocation5] sm:$0xff] %vm22_vm0, %v659_v20 }
 0x215   :  { %714 = shalt.err (!%p711_p9)
}
 0x216   :  { %670 = dma.vmem_to_hbm [thread:$0]  %s668_s11, 128, %s1071_s1, [#allocation4]  }
 0x217   :  { %725 = dma.done.wait [#allocation4], 128  }
 0x218   :  { %726 = vsyncadd [#allocation4], 4294967168 }
 0x219   :  { %674 = vsyncpa [#allocation3], 1 }
 0x21a   :  { %675 = vsyncpa [#allocation4], 1 }

</bundles_post_ra>
